<compile_context>
chip_gen: v7x
topology: tpu7x:2x2x1
jax: 0.10.0
libtpu: 0.0.40
codegen_flags: <defaults>
</compile_context>

<pallas_src>
import math

import jax
import jax.numpy as jnp
from jax import lax
from jax.experimental import pallas as pl
from jax.experimental.pallas import tpu as pltpu


# ---------------------------------------------------------------------------
# Sinusoidal table (PositionalEncoding.__init__), as a dense (max_len, d_model)
# ---------------------------------------------------------------------------
def make_sinusoidal_pe(max_len: int, d_model: int, dtype=jnp.float32):
    position = jnp.arange(max_len, dtype=jnp.float32)[:, None]                  # (L, 1)
    div_term = jnp.exp(
        jnp.arange(0, d_model, 2, dtype=jnp.float32) * (-math.log(10000.0) / d_model)
    )                                                                            # (D/2,)
    pe = jnp.zeros((max_len, d_model), jnp.float32)
    pe = pe.at[:, 0::2].set(jnp.sin(position * div_term))
    pe = pe.at[:, 1::2].set(jnp.cos(position * div_term))
    return pe.astype(dtype)


# ---------------------------------------------------------------------------
# Dropout-mask hash (platform independent: plain int32 ops only)
# ---------------------------------------------------------------------------
def _as_i32(u: int) -> int:
    u &= 0xFFFFFFFF
    return u - (1 << 32) if u >= (1 << 31) else u


def _dropout_bits(gidx, seed_scalar):
    """lowbias32-style hash of (seed, global element index) -> ~uniform int32.

    Uses xor / logical-shift (via mask) / wrap-around int32 multiply, so it
    lowers on TPU Mosaic and in interpret mode alike, and the mask does not
    depend on the tiling or code path.
    """
    # TODO(synk): on v7x (3.2 TB/s HBM) the ~12 int32 VALU ops/element here may
    # cap the *training* path slightly below the memory roofline; for bf16 one
    # could hash a single 32-bit counter per two elements to halve the cost.
    def lshr(v, k):
        return jnp.bitwise_and(jnp.right_shift(v, k),
                               jnp.int32((1 << (32 - k)) - 1))

    v = gidx + seed_scalar * jnp.int32(_as_i32(0x9E3779B9))
    v = jnp.bitwise_xor(v, lshr(v, 16))
    v = v * jnp.int32(_as_i32(0x7FEB352D))
    v = jnp.bitwise_xor(v, lshr(v, 15))
    v = v * jnp.int32(_as_i32(0x846CA68B))
    v = jnp.bitwise_xor(v, lshr(v, 16))
    return v


# ---------------------------------------------------------------------------
# Kernel body (shared by both layouts)
# ---------------------------------------------------------------------------
def _make_kernel(p: float, training: bool, make_gidx):
    apply_dropout = bool(training) and p > 0.0
    drop_all = apply_dropout and p >= 1.0
    if apply_dropout and not drop_all:
        # P(bits >= thr) == 1 - p over the full int32 range.
        thr = int(round(p * (1 << 32))) - (1 << 31)
        thr = max(-(1 << 31), min((1 << 31) - 1, thr))
        inv_keep = 1.0 / (1.0 - p)

    def kernel(seed_ref, x_ref, pe_ref, o_ref):
        y = x_ref[...] + pe_ref[...]
        if drop_all:                       # torch.nn.Dropout(p=1) -> all zeros
            y = jnp.zeros_like(y)
        elif apply_dropout:
            bits = _dropout_bits(make_gidx(y.shape), seed_ref[0])
            keep = bits >= jnp.int32(thr)
            y = jnp.where(keep, y, jnp.zeros_like(y)) * jnp.asarray(inv_keep, y.dtype)
        o_ref[...] = y

    return kernel


# ---------------------------------------------------------------------------
# Generation-aware tiling / VMEM parameters
# ---------------------------------------------------------------------------
def _generation_params():
    """Return (tile_vmem_budget_bytes, vmem_limit_bytes, num_tensorcores)."""
    vmem_cap = None
    kind = ""
    try:
        dev = jax.devices()[0]
        kind = (getattr(dev, "device_kind", "") or "").lower()
        if dev.platform == "tpu":
            vmem_cap = pltpu.get_tpu_info().vmem_capacity_bytes
    except Exception:
        pass
    two_tc = ("v7" in kind) or ("7x" in kind)
    if vmem_cap is not None and vmem_cap >= 96 * (1 << 20):
        # v5e / v6e class: 128 MiB VMEM, single TensorCore.
        return 64 * (1 << 20), 96 * (1 << 20), 1
    if vmem_cap is not None:
        # v7x class: 64 MiB VMEM per TensorCore, 2 TensorCores.
        return 24 * (1 << 20), 48 * (1 << 20), 2
    # Unknown backend (interpret/CPU/emulator): conservative values, valid everywhere.
    return 24 * (1 << 20), 48 * (1 << 20), (2 if two_tc else 1)


def _round_up(x: int, m: int) -> int:
    return ((x + m - 1) // m) * m


# ---------------------------------------------------------------------------
# Forward wrapper
# ---------------------------------------------------------------------------
def positional_encoding_forward(x, pe, *, p: float = 0.1, training: bool = False,
                                seed: int = 0, donate_x: bool = False):
    """Pallas equivalent of PositionalEncoding.forward.

    x  : (seq_len, batch, d_model)
    pe : (max_len, d_model), max_len >= seq_len (see make_sinusoidal_pe)
    """
    S, B, D = x.shape
    L, D2 = pe.shape
    assert D2 == D and L >= S, "pe must be (max_len >= seq_len, d_model)"
    if not (0.0 <= p <= 1.0):
        raise ValueError(f"dropout probability must be in [0, 1], got {p}")

    dtype = x.dtype
    itemsize = jnp.dtype(dtype).itemsize
    sub = max(8, 32 // itemsize)          # sublane multiple: 8 f32 / 16 bf16 / 32 int8
    tile_budget, vmem_limit, n_tc = _generation_params()

    # One-time slice + cast of the table.  NOTE: for bf16/f16 x this keeps the
    # add (and output) in x.dtype, whereas torch's f32 buffer would promote to f32.
    pe_s = pe[:S].astype(dtype)
    seed_arr = jnp.asarray([seed], dtype=jnp.int32)
    # Operand 0 of the pallas_call is the scalar-prefetch seed, so x is operand 1.
    alias = {1: 0} if donate_x else {}

    n_elem = S * B * D
    use_flat = (D % 128 != 0) and (n_elem % 128 == 0)

    if use_flat:
        # --- Path B: lane-dense flat view (d_model not lane aligned) ----------
        # View x / out as a contiguous (n_elem/128, 128) slab -> full vreg lane
        # occupancy, unmasked stores, contiguous DMA bursts.  pe is broadcast-
        # materialized once per call (extra pe read is ~S*B*D bytes, a small
        # price next to the multi-x win on the store/DMA path for small D).
        R = n_elem // 128
        x2 = x.reshape(R, 128)
        pe2 = jnp.broadcast_to(pe_s[:, None, :], (S, B, D)).reshape(R, 128)

        bytes_per_row = 3 * 2 * 128 * itemsize        # {x, pe, out} double-buffered
        tr = max(sub, (tile_budget // bytes_per_row) // sub * sub)
        if R <= tr:
            tr = R                                    # single full-extent tile
            if n_tc >= 2 and R >= 2 * sub:            # give both TCs work on v7x
                tr = _round_up(pl.cdiv(R, 2), sub)
        grid = (pl.cdiv(R, tr),)                      # ragged last tile is fine

        def gidx(shape):                              # flat index into (S, B, D)
            rows = lax.broadcasted_iota(jnp.int32, shape, 0)
            cols = lax.broadcasted_iota(jnp.int32, shape, 1)
            return (pl.program_id(0) * shape[0] + rows) * 128 + cols

        kernel = _make_kernel(p, training, gidx)
        out2 = pl.pallas_call(
            kernel,
            out_shape=jax.ShapeDtypeStruct((R, 128), dtype),
            grid_spec=pltpu.PrefetchScalarGridSpec(
                num_scalar_prefetch=1,                # seed lands in SMEM
                grid=grid,
                in_specs=[pl.BlockSpec((tr, 128), lambda i, *_: (i, 0)),
                          pl.BlockSpec((tr, 128), lambda i, *_: (i, 0))],
                out_specs=pl.BlockSpec((tr, 128), lambda i, *_: (i, 0)),
            ),
            compiler_params=pltpu.CompilerParams(
                dimension_semantics=("parallel",),
                vmem_limit_bytes=vmem_limit),
            cost_estimate=pl.CostEstimate(
                flops=n_elem, transcendentals=0,
                bytes_accessed=3 * n_elem * itemsize),
            input_output_aliases=alias,
        )(seed_arr, x2, pe2)
        return out2.reshape(S, B, D)

    # --- Path A: d_model lane aligned (or rare ragged fallback) ---------------
    # Dense (ts, D) per-batch slabs; batch is the innermost grid axis and pe's
    # index_map ignores it, so the resident pe block is NOT re-DMA'd across the
    # batch loop (pe HBM traffic ~ S*D, total ~ 2*S*B*D + S*D bytes).
    bytes_per_seq_row = 3 * 2 * D * itemsize          # {x, pe, out} double-buffered
    ts = max(sub, (tile_budget // bytes_per_seq_row) // sub * sub)
    if S <= ts:
        ts = S                                        # single full-extent seq tile
        if n_tc >= 2 and B == 1 and S >= 2 * sub:     # only when the batch axis
            ts = _round_up(pl.cdiv(S, 2), sub)        # cannot feed the 2nd TC
    grid = (pl.cdiv(S, ts), B)

    def gidx(shape):                                  # flat index into (S, B, D)
        s = lax.broadcasted_iota(jnp.int32, shape, 0) + pl.program_id(0) * shape[0]
        d = lax.broadcasted_iota(jnp.int32, shape, 1)
        return (s * B + pl.program_id(1)) * D + d

    kernel = _make_kernel(p, training, gidx)
    return pl.pallas_call(
        kernel,
        out_shape=jax.ShapeDtypeStruct((S, B, D), dtype),
        grid_spec=pltpu.PrefetchScalarGridSpec(
            num_scalar_prefetch=1,                    # seed lands in SMEM
            grid=grid,
            in_specs=[
                # x: (ts, 1, D) window, batch dim squeezed -> dense (ts, D) ref.
                pl.BlockSpec((ts, None, D), lambda i, b, *_: (i, b, 0)),
                # pe: same block for every b -> Pallas skips the re-DMA.
                pl.BlockSpec((ts, D), lambda i, b, *_: (i, 0)),
            ],
            out_specs=pl.BlockSpec((ts, None, D), lambda i, b, *_: (i, b, 0)),
        ),
        compiler_params=pltpu.CompilerParams(
            dimension_semantics=("parallel", "parallel"),
            vmem_limit_bytes=vmem_limit),
        cost_estimate=pl.CostEstimate(
            flops=n_elem, transcendentals=0,
            bytes_accessed=(2 * n_elem + S * D) * itemsize),
        input_output_aliases=alias,
    )(seed_arr, x, pe_s)


if __name__ == "__main__":
    # Small shapes consistent with the module's forward: (seq_len, batch, d_model)
    SEQ, BATCH, D_MODEL, MAX_LEN = 8, 2, 32, 64

    key = jax.random.PRNGKey(0)
    x = jax.random.normal(key, (SEQ, BATCH, D_MODEL), dtype=jnp.float32)
    pe = make_sinusoidal_pe(MAX_LEN, D_MODEL)
    ref = x + pe[:SEQ][:, None, :]

    # Eval mode (module.eval()): dropout is the identity.  D=32 -> flat path.
    out = jax.block_until_ready(
        positional_encoding_forward(x, pe, p=0.1, training=False))
    assert out.shape == x.shape and out.dtype == x.dtype
    assert jnp.allclose(out, ref, atol=1e-6, rtol=1e-6)

    # Training mode: inverted dropout with p=0.5 (kept elements scaled by exactly 2).
    out_tr = jax.block_until_ready(
        positional_encoding_forward(x, pe, p=0.5, training=True, seed=1234))
    dropped = out_tr == 0.0
    frac = float(jnp.mean(dropped.astype(jnp.float32)))
    assert 0.2 < frac < 0.8, f"unexpected drop fraction {frac}"
    assert jnp.allclose(jnp.where(dropped, 0.0, 2.0 * ref), out_tr, atol=1e-5, rtol=1e-5)

    # Lane-aligned path (d_model multiple of 128) exercises the pe-reuse kernel.
    D2 = 128
    x2 = jax.random.normal(jax.random.PRNGKey(1), (SEQ, BATCH, D2), dtype=jnp.float32)
    pe2 = make_sinusoidal_pe(MAX_LEN, D2)
    out2 = jax.block_until_ready(positional_encoding_forward(x2, pe2, training=False))
    assert jnp.allclose(out2, x2 + pe2[:SEQ][:, None, :], atol=1e-6, rtol=1e-6)

    print("KERNEL_OK")
</pallas_src>

<mosaic_0001>
module attributes {stable_mosaic.version = 11 : i64} {
  func.func @kernel(%arg0: i32, %arg1: memref<1xi32, #tpu.memory_space<smem>>, %arg2: memref<4x128xf32, #tpu.memory_space<vmem>>, %arg3: memref<4x128xf32, #tpu.memory_space<vmem>>, %arg4: memref<4x128xf32, #tpu.memory_space<vmem>>) attributes {dimension_semantics = [#tpu.dimension_semantics<parallel>], iteration_bounds = array<i64: 1>, scalar_prefetch = 1 : i64, scratch_operands = 0 : i64, tpu.core_type = #tpu.core_type<tc>, window_params = [{transform_indices = @transform_0, window_bounds = array<i64: 4, 128>}, {transform_indices = @transform_1, window_bounds = array<i64: 4, 128>}, {transform_indices = @transform_2, window_bounds = array<i64: 4, 128>}]} {
    %c0 = arith.constant 0 : index
    %c0_0 = arith.constant 0 : index
    %0 = vector.load %arg2[%c0, %c0_0] : memref<4x128xf32, #tpu.memory_space<vmem>>, vector<4x128xf32>
    %c0_1 = arith.constant 0 : index
    %c0_2 = arith.constant 0 : index
    %1 = vector.load %arg3[%c0_1, %c0_2] : memref<4x128xf32, #tpu.memory_space<vmem>>, vector<4x128xf32>
    %2 = arith.addf %0, %1 : vector<4x128xf32>
    %c0_3 = arith.constant 0 : index
    %c0_4 = arith.constant 0 : index
    %3 = vector.load %arg4[%c0_3, %c0_4] : memref<4x128xf32, #tpu.memory_space<vmem>>, vector<4x128xf32>
    tpu.vector_store %arg4[%c0_3, %c0_4], %2 {strides = array<i32>} : memref<4x128xf32, #tpu.memory_space<vmem>>, vector<4x128xf32>,
    return
  }
  func.func @transform_0(%arg0: i32, %arg1: memref<1xi32, #tpu.memory_space<smem>>) -> (i32, i32) {
    %c0_i32 = arith.constant 0 : i32
    %c0_i32_0 = arith.constant 0 : i32
    return %arg0, %c0_i32 : i32, i32
  }
  func.func @transform_1(%arg0: i32, %arg1: memref<1xi32, #tpu.memory_space<smem>>) -> (i32, i32) {
    %c0_i32 = arith.constant 0 : i32
    %c0_i32_0 = arith.constant 0 : i32
    return %arg0, %c0_i32 : i32, i32
  }
  func.func @transform_2(%arg0: i32, %arg1: memref<1xi32, #tpu.memory_space<smem>>) -> (i32, i32) {
    %c0_i32 = arith.constant 0 : i32
    %c0_i32_0 = arith.constant 0 : i32
    return %arg0, %c0_i32 : i32, i32
  }
}

</mosaic_0001>

<bundles_post_ra>
// kernel: tpu_custom_call.1
= control target key start
LH: loop header
LB: loop body
LE: loop exit
PB: predicated region body
PF: predicated region fallthrough
CT: control target
= control target key end

     0   :  { %9 = vsyncpa [#allocation5], 0  ;;  %s144_s0 = inlined_call_operand.<no memory space> [shape: s32[1], index: 0, kind: input, shape index: {}]   ;;  %s145_s1 = inlined_call_operand.hbm [shape: f32[4,128], index: 1, kind: input, shape index: {}]   ;;  %s146_s2 = inlined_call_operand.vmem [shape: f32[4,128], index: 2, kind: input, shape index: {}]   ;;  %s147_s3 = inlined_call_operand.hbm [shape: f32[4,128], index: 3, kind: output, shape index: {}]  }
   0x1   :  { %10 = vsyncpa [#allocation6], 0  ;;  %s95_s12 = smov [#allocation4]   ;;  %s47_s16 = scalar_lea.hbm %s145_s1, 64 }
   0x2   :  { %s17_s13 = sshll.u32 %s95_s12, 4  ;;  %p48_p0 = scmp.ne.s32.totalorder %s145_s1, %s47_s16  ;;  %s18_s13 = int_to_ptr.vmem [resolvable:$true] %s17_s13 }
   0x3   :  { %p51_p1 = scmp.lt.u32.totalorder %s47_s16, %s145_s1 }
   0x5   :  { %p53_p2 = pnand %p51_p1, %p48_p0 }
   0x7   :  { %56 = shalt.err (!%p53_p2)
}
   0x8   :  { %s57_s20 = scalar_lea.vmem %s18_s13, 64  ;;  %p62_p4 = scmp.lt.s32.totalorder %s18_s13, %s18_s13 }
   0x9   :  { %p58_p3 = scmp.ne.s32.totalorder %s18_s13, %s57_s20  ;;  %p63_p5 = scmp.lt.s32.totalorder %s57_s20, %s57_s20 }
   0xb   :  { %p64_p6 = por %p63_p5, %p62_p4 }
   0xd   :  { %p65_p7 = pnand %p64_p6, %p58_p3 }
   0xf   :  { %68 = shalt.err (!%p65_p7)
}
  0x10   :  { %20 = dma.hbm_to_vmem [thread:$0]  %s145_s1, 64, %s18_s13, [#allocation5]  }
  0x11   :  { %91 = dma.done.wait [#allocation5], 64  }
  0x12   :  { %92 = vsyncadd [#allocation5], 4294967232  ;;  %s96_s23 = smov [#allocation7]   ;;  %v26_v0 = vld [vmem:[#allocation4] sm:$0xf] }
  0x13   :  { %s36_s24 = sshll.u32 %s96_s23, 4  ;;  %v27_v1 = vld [vmem:[%s146_s2] sm:$0xf]  ;;  %s37_s24 = int_to_ptr.vmem [resolvable:$true] %s36_s24 }
  0x14   :  { %v28_v2 = vadd.f32 %v27_v1, %v26_v0  ;;  %s69_s27 = scalar_lea.vmem %s37_s24, 64  ;;  %p74_p9 = scmp.lt.s32.totalorder %s37_s24, %s37_s24 }
  0x15   :  { %p70_p8 = scmp.ne.s32.totalorder %s37_s24, %s69_s27  ;;  %p75_p10 = scmp.lt.s32.totalorder %s69_s27, %s69_s27 }
  0x16   :  { %29 = vst [vmem:[#allocation7] sm:$0xf] %v28_v2 }
  0x17   :  { %p76_p11 = por %p75_p10, %p74_p9 }
  0x19   :  { %p77_p12 = pnand %p76_p11, %p70_p8 }
  0x1b   :  { %80 = shalt.err (!%p77_p12)
}
  0x1c   :  { %s81_s29 = scalar_lea.hbm %s147_s3, 64 }
  0x1d   :  { %p82_p13 = scmp.ne.s32.totalorder %s147_s3, %s81_s29  ;;  %p85_p0 = scmp.lt.u32.totalorder %s81_s29, %s147_s3 }
  0x1f   :  { %p87_p1 = pnand %p85_p0, %p82_p13 }
  0x21   :  { %90 = shalt.err (!%p87_p1)
}
  0x22   :  { %39 = dma.vmem_to_hbm [thread:$0]  %s37_s24, 64, %s147_s3, [#allocation6]  }
  0x23   :  { %93 = dma.done.wait [#allocation6], 64  }
  0x24   :  { %94 = vsyncadd [#allocation6], 4294967232 }
  0x25   :  { %43 = vsyncpa [#allocation5], 1 }
  0x26   :  { %44 = vsyncpa [#allocation6], 1 }

</bundles_post_ra>
